<compile_context>
chip_gen: v5e
topology: v5e:2x2
jax: 0.10.0
libtpu: 0.0.40
codegen_flags: <defaults>
</compile_context>

<pallas_src>
import functools
import math

import jax
import jax.numpy as jnp
from jax.experimental import pallas as pl
from jax.experimental.pallas import tpu as pltpu


# ----------------------------------------------------------------------------
# Pallas kernel: `step` fused GNNCell iterations for one batch tile
# ----------------------------------------------------------------------------
def gnn_fused_kernel(a_ref, h_ref, w_h5_ref, b_h5_ref,
                     w_i_in_ref, w_i_out_ref, b_gi_ref, out_ref,
                     *, TB, S, H, step):
    f32 = jnp.float32
    cdt = jnp.bfloat16          # MXU input dtype (accumulation stays f32)

    a_f = a_ref[...]                            # (TB, S, 2S)  f32
    a_in = a_f[:, :, :S].astype(cdt)            # (TB, S, S)
    a_out = a_f[:, :, S:2 * S].astype(cdt)      # (TB, S, S)

    w_h5 = w_h5_ref[...]                        # (H, 5H)  bf16
    w_i_in = w_i_in_ref[...]                    # (H, 3H)  bf16
    w_i_out = w_i_out_ref[...]                  # (H, 3H)  bf16
    b_h5 = b_h5_ref[...]                        # (1, 5H)  f32
    b_gi = b_gi_ref[...]                        # (1, 3H)  f32  (b_ih + folded b_iah/b_oah)

    h = h_ref[...]                              # (TB*S, H)  f32

    for _ in range(step):                       # static unroll; step is small
        # One wide dot from h: [edge_in | edge_out | h_r | h_i | h_n]
        fused = jnp.dot(h.astype(cdt), w_h5,
                        preferred_element_type=f32) + b_h5   # (TB*S, 5H)
        edge_in = fused[:, :H].reshape(TB, S, H).astype(cdt)
        edge_out = fused[:, H:2 * H].reshape(TB, S, H).astype(cdt)
        gh = fused[:, 2 * H:]                                # (TB*S, 3H)

        # Batched (per-session) adjacency matmuls.
        inp_in = jnp.einsum('bij,bjh->bih', a_in, edge_in,
                            preferred_element_type=f32)
        inp_out = jnp.einsum('bij,bjh->bih', a_out, edge_out,
                             preferred_element_type=f32)
        inp_in = inp_in.reshape(TB * S, H).astype(cdt)
        inp_out = inp_out.reshape(TB * S, H).astype(cdt)

        # gi = [inp_in, inp_out] @ w_ih.T + (b_ih + b_iah@Wi_in + b_oah@Wi_out)
        gi = (jnp.dot(inp_in, w_i_in, preferred_element_type=f32)
              + jnp.dot(inp_out, w_i_out, preferred_element_type=f32)
              + b_gi)                                        # (TB*S, 3H)

        # GRU-style gates — f32 elementwise.
        g_ri = jax.nn.sigmoid(gi[:, :2 * H] + gh[:, :2 * H])
        resetgate = g_ri[:, :H]
        inputgate = g_ri[:, H:2 * H]
        newgate = jnp.tanh(gi[:, 2 * H:] + resetgate * gh[:, 2 * H:])
        h = newgate + inputgate * (h - newgate)

    out_ref[...] = h.astype(out_ref.dtype)


# ----------------------------------------------------------------------------
# Wrapper: full GNN propagation (all steps fused in one kernel call)
# ----------------------------------------------------------------------------
def gnn_forward(A, hidden, kp, step=1, tb=64):
    B, S, H = hidden.shape
    TB = min(tb, B)
    Bp = ((B + TB - 1) // TB) * TB
    if Bp != B:  # pad the batch to a multiple of the batch tile
        A = jnp.pad(A, ((0, Bp - B), (0, 0), (0, 0)))
        hidden = jnp.pad(hidden, ((0, Bp - B), (0, 0), (0, 0)))

    h_flat = hidden.reshape(Bp * S, H)          # free wrapper-side reshape

    kernel = functools.partial(gnn_fused_kernel, TB=TB, S=S, H=H, step=step)

    out = pl.pallas_call(
        kernel,
        out_shape=jax.ShapeDtypeStruct((Bp * S, H), jnp.float32),
        grid=(Bp // TB,),
        in_specs=[
            pl.BlockSpec((TB, S, 2 * S), lambda b: (b, 0, 0)),   # A (whole)
            pl.BlockSpec((TB * S, H), lambda b: (b, 0)),         # hidden
            pl.BlockSpec((H, 5 * H), lambda b: (0, 0)),          # fused h-weights
            pl.BlockSpec((1, 5 * H), lambda b: (0, 0)),          # fused h-bias
            pl.BlockSpec((H, 3 * H), lambda b: (0, 0)),          # w_ih in-half
            pl.BlockSpec((H, 3 * H), lambda b: (0, 0)),          # w_ih out-half
            pl.BlockSpec((1, 3 * H), lambda b: (0, 0)),          # fused gi bias
        ],
        out_specs=pl.BlockSpec((TB * S, H), lambda b: (b, 0)),
        compiler_params=pltpu.CompilerParams(
            dimension_semantics=("parallel",)),
    )(A, h_flat, kp['w_h5'], kp['b_h5'], kp['w_i_in'], kp['w_i_out'], kp['b_gi'])

    return out.reshape(Bp, S, H)[:B]


def gmm_session_graph_forward(inputs, A, raw, kp, step=1, tb=64):
    """GMMSessionGraph.forward: embedding lookup (glue) + fused GNN kernel."""
    hidden = jnp.take(raw['emb'], inputs, axis=0)   # [B, S, H]
    return gnn_forward(A, hidden, kp, step=step, tb=tb)


# ----------------------------------------------------------------------------
# Deterministic parameter init (matches reset_parameters('uniform') shapes)
# ----------------------------------------------------------------------------
def init_params(key, n_node, H):
    stdv = 1.0 / math.sqrt(H)
    ks = jax.random.split(key, 11)

    def u(k, shape):
        return jax.random.uniform(k, shape, jnp.float32, -stdv, stdv)

    raw = dict(
        emb=u(ks[0], (n_node, H)),
        w_ih=u(ks[1], (3 * H, 2 * H)),
        w_hh=u(ks[2], (3 * H, H)),
        b_ih=u(ks[3], (3 * H,)),
        b_hh=u(ks[4], (3 * H,)),
        b_iah=u(ks[5], (H,)),
        b_oah=u(ks[6], (H,)),
        w_ein=u(ks[7], (H, H)), b_ein=u(ks[8], (H,)),
        w_eout=u(ks[9], (H, H)), b_eout=u(ks[10], (H,)),
    )

    # Kernel-friendly fused layout.
    w_ih, w_hh = raw['w_ih'], raw['w_hh']
    wi_in = w_ih[:, :H].T       # (H, 3H)  in-half of w_ih^T
    wi_out = w_ih[:, H:].T      # (H, 3H)  out-half of w_ih^T
    w_h5 = jnp.concatenate([raw['w_ein'].T, raw['w_eout'].T, w_hh.T], axis=1)  # (H, 5H)
    b_h5 = jnp.concatenate([raw['b_ein'], raw['b_eout'], raw['b_hh']])[None, :]  # (1, 5H)
    # b_iah / b_oah only ever feed gi, so fold them into b_ih exactly.
    b_gi = (raw['b_ih'] + raw['b_iah'] @ wi_in + raw['b_oah'] @ wi_out)[None, :]  # (1, 3H)

    kp = dict(
        w_h5=w_h5.astype(jnp.bfloat16),
        b_h5=b_h5.astype(jnp.float32),
        w_i_in=wi_in.astype(jnp.bfloat16),
        w_i_out=wi_out.astype(jnp.bfloat16),
        b_gi=b_gi.astype(jnp.float32),
    )
    return raw, kp


# ----------------------------------------------------------------------------
# Pure-JAX reference of GNNCell / forward (for sanity check)
# ----------------------------------------------------------------------------
def gnn_cell_ref(A, hidden, raw):
    S = A.shape[1]
    H = hidden.shape[-1]
    edge_in = hidden @ raw['w_ein'].T + raw['b_ein']
    edge_out = hidden @ raw['w_eout'].T + raw['b_eout']
    input_in = A[:, :, :S] @ edge_in + raw['b_iah']
    input_out = A[:, :, S:2 * S] @ edge_out + raw['b_oah']
    inputs = jnp.concatenate([input_in, input_out], axis=2)
    gi = inputs @ raw['w_ih'].T + raw['b_ih']
    gh = hidden @ raw['w_hh'].T + raw['b_hh']
    i_r, i_i, i_n = gi[..., :H], gi[..., H:2 * H], gi[..., 2 * H:]
    h_r, h_i, h_n = gh[..., :H], gh[..., H:2 * H], gh[..., 2 * H:]
    resetgate = jax.nn.sigmoid(i_r + h_r)
    inputgate = jax.nn.sigmoid(i_i + h_i)
    newgate = jnp.tanh(i_n + resetgate * h_n)
    return newgate + inputgate * (hidden - newgate)


def forward_ref(inputs, A, raw, step=1):
    hidden = jnp.take(raw['emb'], inputs, axis=0)
    for _ in range(step):
        hidden = gnn_cell_ref(A, hidden, raw)
    return hidden


# TODO(synk): compute_scores() depends on an external pickled sklearn GMM
# (self.gmm.predict) with no in-kernel equivalent; only forward() is
# implemented here, matching the module's forward pass.

if __name__ == "__main__":
    B, S, H, N_NODE, STEP = 2, 8, 32, 64, 1

    key = jax.random.PRNGKey(0)
    k_param, k_inp, k_adj = jax.random.split(key, 3)

    raw, kp = init_params(k_param, N_NODE, H)

    inputs = jax.random.randint(k_inp, (B, S), 0, N_NODE, dtype=jnp.int32)
    A = jax.random.uniform(k_adj, (B, S, 2 * S), jnp.float32)

    out = jax.block_until_ready(
        gmm_session_graph_forward(inputs, A, raw, kp, step=STEP))
    ref = jax.block_until_ready(forward_ref(inputs, A, raw, step=STEP))
    assert out.shape == (B, S, H)
    assert jnp.allclose(out, ref, rtol=2e-2, atol=2e-2)

    # Second check: multi-tile grid + batch padding + fused multi-step loop.
    B2, STEP2, TB2 = 5, 2, 2
    inputs2 = jax.random.randint(jax.random.PRNGKey(1), (B2, S), 0, N_NODE,
                                 dtype=jnp.int32)
    A2 = jax.random.uniform(jax.random.PRNGKey(2), (B2, S, 2 * S), jnp.float32)
    out2 = jax.block_until_ready(
        gmm_session_graph_forward(inputs2, A2, raw, kp, step=STEP2, tb=TB2))
    ref2 = jax.block_until_ready(forward_ref(inputs2, A2, raw, step=STEP2))
    assert out2.shape == (B2, S, H)
    assert jnp.allclose(out2, ref2, rtol=5e-2, atol=5e-2)

    print("KERNEL_OK")
</pallas_src>

<mosaic_0001>
module attributes {stable_mosaic.version = 11 : i64} {
  func.func @gnn_fused_kernel(%arg0: i32, %arg1: memref<2x8x16xf32, #tpu.memory_space<vmem>>, %arg2: memref<16x32xf32, #tpu.memory_space<vmem>>, %arg3: memref<32x160xbf16, #tpu.memory_space<vmem>>, %arg4: memref<1x160xf32, #tpu.memory_space<vmem>>, %arg5: memref<32x96xbf16, #tpu.memory_space<vmem>>, %arg6: memref<32x96xbf16, #tpu.memory_space<vmem>>, %arg7: memref<1x96xf32, #tpu.memory_space<vmem>>, %arg8: memref<16x32xf32, #tpu.memory_space<vmem>>) attributes {dimension_semantics = [#tpu.dimension_semantics<parallel>], iteration_bounds = array<i64: 1>, scalar_prefetch = 0 : i64, scratch_operands = 0 : i64, tpu.core_type = #tpu.core_type<tc>, window_params = [{transform_indices = @transform_0, window_bounds = array<i64: 2, 8, 16>}, {transform_indices = @transform_1, window_bounds = array<i64: 16, 32>}, {pipeline_mode = #tpu.pipeline_mode<synchronous>, transform_indices = @transform_2, window_bounds = array<i64: 32, 160>}, {pipeline_mode = #tpu.pipeline_mode<synchronous>, transform_indices = @transform_3, window_bounds = array<i64: 1, 160>}, {pipeline_mode = #tpu.pipeline_mode<synchronous>, transform_indices = @transform_4, window_bounds = array<i64: 32, 96>}, {pipeline_mode = #tpu.pipeline_mode<synchronous>, transform_indices = @transform_5, window_bounds = array<i64: 32, 96>}, {pipeline_mode = #tpu.pipeline_mode<synchronous>, transform_indices = @transform_6, window_bounds = array<i64: 1, 96>}, {transform_indices = @transform_7, window_bounds = array<i64: 16, 32>}]} {
    %c0 = arith.constant 0 : index
    %c0_0 = arith.constant 0 : index
    %c0_1 = arith.constant 0 : index
    %0 = vector.load %arg1[%c0, %c0_0, %c0_1] : memref<2x8x16xf32, #tpu.memory_space<vmem>>, vector<2x8x16xf32>
    %1 = vector.extract_strided_slice %0 {offsets = [0, 0, 0], sizes = [2, 8, 8], strides = [1, 1, 1]} : vector<2x8x16xf32> to vector<2x8x8xf32>
    %2 = arith.truncf %1 : vector<2x8x8xf32> to vector<2x8x8xbf16>
    %3 = vector.extract_strided_slice %0 {offsets = [0, 0, 8], sizes = [2, 8, 8], strides = [1, 1, 1]} : vector<2x8x16xf32> to vector<2x8x8xf32>
    %4 = arith.truncf %3 : vector<2x8x8xf32> to vector<2x8x8xbf16>
    %c0_2 = arith.constant 0 : index
    %c0_3 = arith.constant 0 : index
    %5 = vector.load %arg3[%c0_2, %c0_3] : memref<32x160xbf16, #tpu.memory_space<vmem>>, vector<32x160xbf16>
    %c0_4 = arith.constant 0 : index
    %c0_5 = arith.constant 0 : index
    %6 = vector.load %arg5[%c0_4, %c0_5] : memref<32x96xbf16, #tpu.memory_space<vmem>>, vector<32x96xbf16>
    %c0_6 = arith.constant 0 : index
    %c0_7 = arith.constant 0 : index
    %7 = vector.load %arg6[%c0_6, %c0_7] : memref<32x96xbf16, #tpu.memory_space<vmem>>, vector<32x96xbf16>
    %c0_8 = arith.constant 0 : index
    %c0_9 = arith.constant 0 : index
    %8 = vector.load %arg4[%c0_8, %c0_9] : memref<1x160xf32, #tpu.memory_space<vmem>>, vector<1x160xf32>
    %c0_10 = arith.constant 0 : index
    %c0_11 = arith.constant 0 : index
    %9 = vector.load %arg7[%c0_10, %c0_11] : memref<1x96xf32, #tpu.memory_space<vmem>>, vector<1x96xf32>
    %c0_12 = arith.constant 0 : index
    %c0_13 = arith.constant 0 : index
    %10 = vector.load %arg2[%c0_12, %c0_13] : memref<16x32xf32, #tpu.memory_space<vmem>>, vector<16x32xf32>
    %11 = arith.truncf %10 : vector<16x32xf32> to vector<16x32xbf16>
    %cst = arith.constant dense<0.000000e+00> : vector<16x160xf32>
    %12 = tpu.matmul %11, %5, %cst {dimension_numbers = #tpu.dot_dimension_numbers<[1], [0], [0], [1], [0, 0, 1, 1], [], []>} : vector<16x32xbf16>, vector<32x160xbf16>, vector<16x160xf32> -> vector<16x160xf32>
    %13 = vector.broadcast %8 : vector<1x160xf32> to vector<16x160xf32>
    %14 = arith.addf %12, %13 : vector<16x160xf32>
    %15 = vector.extract_strided_slice %14 {offsets = [0, 0], sizes = [16, 32], strides = [1, 1]} : vector<16x160xf32> to vector<16x32xf32>
    %16 = vector.shape_cast %15 : vector<16x32xf32> to vector<2x8x32xf32>
    %17 = arith.truncf %16 : vector<2x8x32xf32> to vector<2x8x32xbf16>
    %18 = vector.extract_strided_slice %14 {offsets = [0, 32], sizes = [16, 32], strides = [1, 1]} : vector<16x160xf32> to vector<16x32xf32>
    %19 = vector.shape_cast %18 : vector<16x32xf32> to vector<2x8x32xf32>
    %20 = arith.truncf %19 : vector<2x8x32xf32> to vector<2x8x32xbf16>
    %21 = vector.extract_strided_slice %14 {offsets = [0, 64], sizes = [16, 96], strides = [1, 1]} : vector<16x160xf32> to vector<16x96xf32>
    "tpu.trace_start"() <{level = 10 : i32, message = "bij,bjh->bih"}> : () -> ()
    %cst_14 = arith.constant dense<0.000000e+00> : vector<2x8x32xf32>
    %22 = tpu.matmul %2, %17, %cst_14 {dimension_numbers = #tpu.dot_dimension_numbers<[2], [1], [1], [2], [0, 0, 0, 1, 1, 2], [0], [0]>} : vector<2x8x8xbf16>, vector<2x8x32xbf16>, vector<2x8x32xf32> -> vector<2x8x32xf32>
    %cst_15 = arith.constant dense<0.000000e+00> : vector<2x8x32xf32>
    %23 = tpu.matmul %4, %20, %cst_15 {dimension_numbers = #tpu.dot_dimension_numbers<[2], [1], [1], [2], [0, 0, 0, 1, 1, 2], [0], [0]>} : vector<2x8x8xbf16>, vector<2x8x32xbf16>, vector<2x8x32xf32> -> vector<2x8x32xf32>
    "tpu.trace_stop"() : () -> ()
    %24 = vector.shape_cast %22 : vector<2x8x32xf32> to vector<16x32xf32>
    %25 = arith.truncf %24 : vector<16x32xf32> to vector<16x32xbf16>
    %26 = vector.shape_cast %23 : vector<2x8x32xf32> to vector<16x32xf32>
    %27 = arith.truncf %26 : vector<16x32xf32> to vector<16x32xbf16>
    %cst_16 = arith.constant dense<0.000000e+00> : vector<16x96xf32>
    %28 = tpu.matmul %25, %6, %cst_16 {dimension_numbers = #tpu.dot_dimension_numbers<[1], [0], [0], [1], [0, 0, 1, 1], [], []>} : vector<16x32xbf16>, vector<32x96xbf16>, vector<16x96xf32> -> vector<16x96xf32>
    %cst_17 = arith.constant dense<0.000000e+00> : vector<16x96xf32>
    %29 = tpu.matmul %27, %7, %cst_17 {dimension_numbers = #tpu.dot_dimension_numbers<[1], [0], [0], [1], [0, 0, 1, 1], [], []>} : vector<16x32xbf16>, vector<32x96xbf16>, vector<16x96xf32> -> vector<16x96xf32>
    %30 = arith.addf %28, %29 : vector<16x96xf32>
    %31 = vector.broadcast %9 : vector<1x96xf32> to vector<16x96xf32>
    %32 = arith.addf %30, %31 : vector<16x96xf32>
    %33 = vector.extract_strided_slice %32 {offsets = [0, 0], sizes = [16, 64], strides = [1, 1]} : vector<16x96xf32> to vector<16x64xf32>
    %34 = vector.extract_strided_slice %21 {offsets = [0, 0], sizes = [16, 64], strides = [1, 1]} : vector<16x96xf32> to vector<16x64xf32>
    %35 = arith.addf %33, %34 : vector<16x64xf32>
    %36 = arith.negf %35 : vector<16x64xf32>
    %37 = math.exp %36 : vector<16x64xf32>
    %cst_18 = arith.constant 1.000000e+00 : f32
    %38 = vector.broadcast %cst_18 : f32 to vector<16x64xf32>
    %39 = arith.addf %38, %37 : vector<16x64xf32>
    %40 = arith.divf %38, %39 : vector<16x64xf32>
    %41 = vector.extract_strided_slice %40 {offsets = [0, 0], sizes = [16, 32], strides = [1, 1]} : vector<16x64xf32> to vector<16x32xf32>
    %42 = vector.extract_strided_slice %40 {offsets = [0, 32], sizes = [16, 32], strides = [1, 1]} : vector<16x64xf32> to vector<16x32xf32>
    %43 = vector.extract_strided_slice %32 {offsets = [0, 64], sizes = [16, 32], strides = [1, 1]} : vector<16x96xf32> to vector<16x32xf32>
    %44 = vector.extract_strided_slice %21 {offsets = [0, 64], sizes = [16, 32], strides = [1, 1]} : vector<16x96xf32> to vector<16x32xf32>
    %45 = arith.mulf %41, %44 : vector<16x32xf32>
    %46 = arith.addf %43, %45 : vector<16x32xf32>
    %47 = math.tanh %46 : vector<16x32xf32>
    %48 = arith.subf %10, %47 : vector<16x32xf32>
    %49 = arith.mulf %42, %48 : vector<16x32xf32>
    %50 = arith.addf %47, %49 : vector<16x32xf32>
    %c0_19 = arith.constant 0 : index
    %c0_20 = arith.constant 0 : index
    %51 = vector.load %arg8[%c0_19, %c0_20] : memref<16x32xf32, #tpu.memory_space<vmem>>, vector<16x32xf32>
    tpu.vector_store %arg8[%c0_19, %c0_20], %50 {strides = array<i32>} : memref<16x32xf32, #tpu.memory_space<vmem>>, vector<16x32xf32>,
    return
  }
  func.func @transform_0(%arg0: i32) -> (i32, i32, i32) {
    %c0_i32 = arith.constant 0 : i32
    %c0_i32_0 = arith.constant 0 : i32
    %c0_i32_1 = arith.constant 0 : i32
    return %arg0, %c0_i32, %c0_i32_0 : i32, i32, i32
  }
  func.func @transform_1(%arg0: i32) -> (i32, i32) {
    %c0_i32 = arith.constant 0 : i32
    %c0_i32_0 = arith.constant 0 : i32
    return %arg0, %c0_i32 : i32, i32
  }
  func.func @transform_2(%arg0: i32) -> (i32, i32) {
    %c0_i32 = arith.constant 0 : i32
    %c0_i32_0 = arith.constant 0 : i32
    %c0_i32_1 = arith.constant 0 : i32
    return %c0_i32, %c0_i32_0 : i32, i32
  }
  func.func @transform_3(%arg0: i32) -> (i32, i32) {
    %c0_i32 = arith.constant 0 : i32
    %c0_i32_0 = arith.constant 0 : i32
    %c0_i32_1 = arith.constant 0 : i32
    return %c0_i32, %c0_i32_0 : i32, i32
  }
  func.func @transform_4(%arg0: i32) -> (i32, i32) {
    %c0_i32 = arith.constant 0 : i32
    %c0_i32_0 = arith.constant 0 : i32
    %c0_i32_1 = arith.constant 0 : i32
    return %c0_i32, %c0_i32_0 : i32, i32
  }
  func.func @transform_5(%arg0: i32) -> (i32, i32) {
    %c0_i32 = arith.constant 0 : i32
    %c0_i32_0 = arith.constant 0 : i32
    %c0_i32_1 = arith.constant 0 : i32
    return %c0_i32, %c0_i32_0 : i32, i32
  }
  func.func @transform_6(%arg0: i32) -> (i32, i32) {
    %c0_i32 = arith.constant 0 : i32
    %c0_i32_0 = arith.constant 0 : i32
    %c0_i32_1 = arith.constant 0 : i32
    return %c0_i32, %c0_i32_0 : i32, i32
  }
  func.func @transform_7(%arg0: i32) -> (i32, i32) {
    %c0_i32 = arith.constant 0 : i32
    %c0_i32_0 = arith.constant 0 : i32
    return %arg0, %c0_i32 : i32, i32
  }
}

</mosaic_0001>

<bundles_post_ra>
// kernel: tpu_custom_call.1
= control target key start
LH: loop header
LB: loop body
LE: loop exit
PB: predicated region body
PF: predicated region fallthrough
CT: control target
= control target key end

     0   :  { %12 = vsyncpa [#allocation3], 0  ;;  %s827_s0 = inlined_call_operand.hbm [shape: f32[2,8,16], index: 0, kind: input, shape index: {}]   ;;  %s828_s1 = inlined_call_operand.hbm [shape: f32[16,32], index: 1, kind: input, shape index: {}]   ;;  %s829_s2 = inlined_call_operand.hbm [shape: bf16[32,160], index: 2, kind: input, shape index: {}]   ;;  %s830_s3 = inlined_call_operand.vmem [shape: f32[1,160], index: 3, kind: input, shape index: {}]   ;;  %s831_s4 = inlined_call_operand.hbm [shape: bf16[32,96], index: 4, kind: input, shape index: {}]   ;;  %s832_s5 = inlined_call_operand.hbm [shape: bf16[32,96], index: 5, kind: input, shape index: {}]   ;;  %s833_s6 = inlined_call_operand.vmem [shape: f32[1,96], index: 6, kind: input, shape index: {}]   ;;  %s834_s7 = inlined_call_operand.hbm [shape: f32[16,32], index: 7, kind: output, shape index: {}]  }
   0x1   :  { %13 = vsyncpa [#allocation6], 0 }
   0x2   :  { %14 = vsyncpa [#allocation9], 0 }
   0x3   :  { %15 = vsyncpa [#allocation4], 0  ;;  %s33_s26 = sshll.u32 %s828_s1, 4  ;;  %s700_s27 = smov [#allocation5]   ;;  %s34_s26 = int_to_ptr.hbm [resolvable:$true] %s33_s26 }
   0x4   :  { %s35_s28 = sshll.u32 %s700_s27, 4  ;;  %s61_s8 = sshll.u32 %s831_s4, 4  ;;  %s36_s28 = int_to_ptr.vmem [resolvable:$true] %s35_s28  ;;  %s62_s8 = int_to_ptr.hbm [resolvable:$true] %s61_s8 }
   0x5   :  { %s701_s9 = smov 128   ;;  %s702_s10 = smov 8  }
   0x6   :  { %41 = dma.hbm_to_vmem [thread:$0]  %s34_s26, 256, %s36_s28, [#allocation6], %s701_s9, %s701_s9, %s702_s10  }
   0x7   :  { %s703_s11 = smov [#allocation8]   ;;  %s704_s13 = smov 64  }
   0x8   :  { %s63_s12 = sshll.u32 %s703_s11, 4  ;;  %s705_s1 = smov 4   ;;  %s64_s12 = int_to_ptr.vmem [resolvable:$true] %s63_s12 }
   0x9   :  { %69 = dma.hbm_to_vmem [thread:$0]  %s62_s8, 256, %s64_s12, [#allocation9], %s704_s13, %s704_s13, %s705_s1  }
   0xa   :  { %s20_s16 = sshll.u32 %s827_s0, 4  ;;  %s706_s4 = smov [#allocation2]   ;;  %s21_s16 = int_to_ptr.hbm [resolvable:$true] %s20_s16 }
   0xb   :  { %s22_s17 = sshll.u32 %s706_s4, 4  ;;  %s46_s20 = sshll.u32 %s829_s2, 4  ;;  %s23_s17 = int_to_ptr.vmem [resolvable:$true] %s22_s17  ;;  %s47_s20 = int_to_ptr.hbm [resolvable:$true] %s46_s20 }
   0xc   :  { %28 = dma.hbm_to_vmem [thread:$0]  %s21_s16, 256, %s23_s17, [#allocation3], %s701_s9, %s701_s9, %s702_s10  }
   0xd   :  { %s707_s21 = smov [#allocation7]   ;;  %s74_s25 = sshll.u32 %s832_s5, 4  ;;  %s75_s25 = int_to_ptr.hbm [resolvable:$true] %s74_s25 }
   0xe   :  { %s48_s22 = sshll.u32 %s707_s21, 4  ;;  %s708_s0 = smov [#allocation10]   ;;  %s49_s22 = int_to_ptr.vmem [resolvable:$true] %s48_s22 }
   0xf   :  { %54 = dma.hbm_to_vmem [thread:$0]  %s47_s20, 512, %s49_s22, [#allocation6], %s701_s9, %s701_s9, %s702_s10  }
  0x10   :  { %s76_s26 = sshll.u32 %s708_s0, 4  ;;  %s77_s26 = int_to_ptr.vmem [resolvable:$true] %s76_s26 }
  0x11   :  { %82 = dma.hbm_to_vmem [thread:$0]  %s75_s25, 256, %s77_s26, [#allocation9], %s704_s13, %s704_s13, %s705_s1  }
  0x12   :  { %692 = dma.done.wait [#allocation3], 256  }
  0x13   :  { %693 = vsyncadd [#allocation3], 4294967040 }
  0x14   :  { %694 = dma.done.wait [#allocation6], 768  }
  0x15   :  { %695 = vsyncadd [#allocation6], 4294966528 }
  0x16   :  { %696 = dma.done.wait [#allocation9], 512  }
  0x17   :  { %697 = vsyncadd [#allocation9], 4294966784  ;;  %v482_v0 = vld [vmem:[#allocation7 + $0x10] sm:$0xf]  ;;  %v517_v1 = vld [vmem:[#allocation7 + $0x14] sm:$0xf0] }
  0x18   :  { %v474_v2 = vld [vmem:[#allocation7] sm:$0xf]  ;;  %v483_v3 = vor.u32 %v517_v1, %v482_v0  ;;  %v515_v4 = vld [vmem:[#allocation7 + $0x4] sm:$0xf0]  ;;  %v781_v6 = vld [vmem:[#allocation5] sm:$0xff]  ;;  %vm152_vm0 = vcmask 261120  }
  0x19   :  { %v475_v5 = vor.u32 %v515_v4, %v474_v2  ;;  %v783_v7 = vld [vmem:[#allocation5 + $0x8] sm:$0xff]  ;;  %v106_v9 = vld [vmem:[#allocation2] sm:$0xff]  ;;  %s709_s2 = smov 120   ;;  %v107_v13 = vld [vmem:[#allocation2 + $0x8] sm:$0xff]  ;;  %vm190_vm1 = vcmask 1043456   ;;  %s710_s28 = smov 96  }
  0x1a   :  { %162 = vmatpush.bf16.msra.mxu0 %v483_v3  ;;  %v126_v8 = vpack.c.bf16 %v783_v7, %v781_v6  ;;  %v108_v10 = vpack.c.bf16 %v106_v9, %v106_v9  ;;  %v109_v14 = vpack.c.bf16 %v107_v13, %v107_v13  ;;  %v791_v17 = vld [vmem:[%s830_s3] sm:$0x3]  ;;  %vm186_vm2 = vcmask 64512   ;;  %v516_v31 = vld [vmem:[#allocation7 + $0x14] sm:$0xf]  ;;  %v519_v43 = vld [vmem:[#allocation8 + $0x8] sm:$0xff] }
  0x1b   :  { %v128_v18 = vperm.slane %v791_v17, 0  ;;  %v484_v32 = vld [vmem:[#allocation7 + $0x18] sm:$0xf0]  ;;  %v514_v33 = vld [vmem:[#allocation7 + $0x4] sm:$0xf]  ;;  %v520_v51 = vld [vmem:[#allocation10] sm:$0xff] }
  0x1c   :  { %v227_v11 = vunpack.c.l.b16 %v108_v10  ;;  %v256_v15 = vunpack.c.l.b16 %v109_v14  ;;  %v487_v34 = vor.u32 %v516_v31, %v484_v32  ;;  %v476_v35 = vld [vmem:[#allocation7 + $0x8] sm:$0xf0]  ;;  %v518_v44 = vld [vmem:[#allocation8] sm:$0xff]  ;;  %v521_v45 = vld [vmem:[#allocation10 + $0x8] sm:$0xff]  ;;  %s712_s30 = smov [#allocation11]   ;;  %s457_s1 = sshll.u32 %s834_s7, 4  ;;  %s458_s1 = int_to_ptr.hbm [resolvable:$true] %s457_s1 }
  0x1d   :  { %v479_v36 = vor.u32 %v514_v33, %v476_v35  ;;  %v535_v60 = vld [vmem:[%s833_s6] ss:$0 sm:$0xff]  ;;  %s711_s6 = smov 32   ;;  %s455_s8 = sshll.u32 %s712_s30, 4  ;;  %s456_s8 = int_to_ptr.vmem [resolvable:$true] %s455_s8 }
  0x1e   :  { %163 = vmatpush.bf16.msra.mxu0 %v475_v5  ;;  %v228_v12 = vpack.c.b16 %v227_v11, %v227_v11  ;;  %v257_v16 = vpack.c.b16 %v256_v15, %v256_v15  ;;  %176 = vmatpush.bf16.msra.mxu1 %v487_v34 }
  0x20   :  { %229 = vrot.lane.b32.xlu1 %v228_v12, %s709_s2 }
  0x21   :  { %488 = vmatmul.msk.bf16.vlgmr.msra.gmra.mxu0 %vm152_vm0, %v126_v8 }
  0x22   :  { %177 = vmatpush.bf16.msra.mxu1 %v479_v36  ;;  %307 = vmatpush.bf16.msrb.mxu0 %v521_v45 }
  0x25   :  { %489 = vmatmul.msk.bf16.vlgmr.msra.gmra.mxu1 %vm152_vm0, %v126_v8 }
  0x26   :  { %336 = vmatpush.bf16.msrb.mxu1 %v519_v43  ;;  %308 = vmatpush.bf16.msrb.mxu0 %v520_v51 }
  0x28   :  { %258 = vrot.lane.b32.xlu1 %v257_v16, %s709_s2 }
  0x2a   :  { %337 = vmatpush.bf16.msrb.mxu1 %v518_v44 }
  0x92   :  { %v230_v38 = vpop.permute.xlu1 %229 }
  0x9a   :  { %v259_v42 = vpop.permute.xlu1 %258 }
  0x9e   :  { %v165_v19 = vpop.f32.mrf.mxu0 }
  0x9f   :  { %v166_v20 = vadd.f32 %v165_v19, %v128_v18 }
  0xa1   :  { %351 = vrot.lane.b32.xlu2 %v166_v20, %s704_s13  ;;  %v184_v21 = vpack.c.bf16 %v166_v20, %v166_v20 }
  0xa2   :  { %v179_v57 = vpop.f32.mrf.mxu1 }
  0xa3   :  { %v192_v22 = vsel %vm190_vm1, %v184_v21, 0  ;;  %v232_v23 = vunpack.c.l.b16 %v184_v21  ;;  %v129_v21 = vperm.slane %v791_v17, 1 }
  0xa4   :  { %201 = vmatpush.bf16.msra.mxu2 %v192_v22 }
  0xa5   :  { %v233_v24 = vpack.c.b16 %v232_v23, %v232_v23 }
  0xa6   :  { %v167_v25 = vpop.f32.mrf.mxu0 }
  0xa7   :  { %v168_v26 = vadd.f32 %v167_v25, %v128_v18  ;;  %234 = vrot.lane.b32.xlu0 %v233_v24, %s710_s28  ;;  %490 = vmatmul.msk.bf16.vlgmr.msra.gmra.mxu2 %vm186_vm2, %v108_v10 }
  0xa9   :  { %353 = vrot.lane.b32.xlu2 %v168_v26, %s704_s13  ;;  %v185_v27 = vpack.c.bf16 %v168_v26, %v168_v26 }
  0xaa   :  { %v181_v58 = vpop.f32.mrf.mxu1 }
  0xab   :  { %v211_v28 = vsel %vm190_vm1, %v185_v27, 0  ;;  %v261_v29 = vunpack.c.l.b16 %v185_v27  ;;  %v180_v27 = vadd.f32 %v179_v57, %v129_v21 }
  0xac   :  { %220 = vmatpush.bf16.msra.mxu3 %v211_v28 }
  0xad   :  { %v262_v30 = vpack.c.b16 %v261_v29, %v261_v29 }
  0xaf   :  { %263 = vrot.lane.b32.xlu0 %v262_v30, %s710_s28  ;;  %491 = vmatmul.msk.bf16.vlgmr.msra.gmra.mxu3 %vm186_vm2, %v109_v14 }
  0xfb   :  { %v352_v63 = vpop.permute.xlu2 %351 }
 0x103   :  { %v354_v9 = vpop.permute.xlu2 %353 }
 0x119   :  { %v235_v37 = vpop.permute.xlu0 %234 }
 0x11a   :  { %v240_v39 = vsel %vm190_vm1, %v235_v37, 0  ;;  %v182_v37 = vadd.f32 %v181_v58, %v129_v21 }
 0x11b   :  { %249 = vmatpush.bf16.msrb.mxu2 %v240_v39 }
 0x11e   :  { %492 = vmatmul.msk.bf16.vlgmr.msrb.gmra.mxu2 %vm186_vm2, %v230_v38 }
 0x121   :  { %v264_v40 = vpop.permute.xlu0 %263 }
 0x122   :  { %v269_v41 = vsel %vm190_vm1, %v264_v40, 0 }
 0x123   :  { %278 = vmatpush.bf16.msrb.mxu3 %v269_v41 }
 0x126   :  { %493 = vmatmul.msk.bf16.vlgmr.msrb.gmra.mxu3 %vm186_vm2, %v259_v42 }
 0x12a   :  { %v203_v46 = vpop.f32.mrf.mxu2 }
 0x132   :  { %v222_v47 = vpop.f32.mrf.mxu3  ;;  %v205_v49 = vpop.f32.mrf.mxu2 }
 0x133   :  { %v284_v48 = vpack.c.bf16 %v222_v47, %v203_v46 }
 0x135   :  { %511 = vmatmul.msk.bf16.vlgmr.msrb.gmra.mxu1 %vm152_vm0, %v284_v48 }
 0x13a   :  { %v224_v50 = vpop.f32.mrf.mxu3 }
 0x1a1   :  { %v251_v52 = vpop.f32.mrf.mxu2 }
 0x1a9   :  { %v280_v53 = vpop.f32.mrf.mxu3  ;;  %v253_v54 = vpop.f32.mrf.mxu2 }
 0x1aa   :  { %v285_v55 = vpack.c.bf16 %v280_v53, %v251_v52 }
 0x1ac   :  { %502 = vmatmul.msk.bf16.vlgmr.msrb.gmra.mxu0 %vm152_vm0, %v285_v55 }
 0x1b1   :  { %v282_v56 = vpop.f32.mrf.mxu3 }
 0x1b2   :  { %v339_v59 = vpop.f32.mrf.mxu1 }
 0x1ba   :  { %v341_v3 = vpop.f32.mrf.mxu1 }
 0x229   :  { %v310_v61 = vpop.f32.mrf.mxu0 }
 0x22a   :  { %v340_v62 = vadd.f32 %v339_v59, %v310_v61 }
 0x22c   :  { %v347_v0 = vadd.f32 %v535_v60, %v340_v62 }
 0x22e   :  { %v357_v1 = vadd.f32 %v352_v63, %v347_v0 }
 0x230   :  { %v512_v2 = vmul.f32 -1.442695, %v357_v1 }
 0x231   :  { %v312_v4 = vpop.f32.mrf.mxu0 }
 0x232   :  { %536 = vpow2.f32 %v512_v2  ;;  %v342_v5 = vadd.f32 %v341_v3, %v312_v4 }
 0x234   :  { %v348_v8 = vadd.f32 %v535_v60, %v342_v5 }
 0x236   :  { %v358_v10 = vadd.f32 %v354_v9, %v348_v8 }
 0x238   :  { %v537_v11 = vpop.eup %536  ;;  %v513_v12 = vmul.f32 -1.442695, %v358_v10 }
 0x239   :  { %v365_v13 = vadd.f32 1.0, %v537_v11 }
 0x23a   :  { %538 = vpow2.f32 %v513_v12 }
 0x23b   :  { %540 = vrcp.f32 %v365_v13  ;;  %v378_v20 = vand.u32 2147483648, %v365_v13  ;;  %v376_v23 = vand.u32 2147483647, %v365_v13  ;;  %vm372_vm4 = vweird.f32 %v365_v13 }
 0x23d   :  { %v379_v26 = vor.u32 1.1754944e-38, %v378_v20  ;;  %vm377_vm6 = vcmp.eq.f32.partialorder %v376_v23, 8.507059e+37 }
 0x240   :  { %v539_v14 = vpop.eup %538 }
 0x241   :  { %v541_v15 = vpop.eup %540  ;;  %v366_v16 = vadd.f32 1.0, %v539_v14 }
 0x242   :  { %v368_v18 = vmul.f32 %v541_v15, %v365_v13  ;;  %vm373_vm3 = vweird.f32 %v541_v15 }
 0x243   :  { %542 = vrcp.f32 %v366_v16  ;;  %vm374_vm5 = vmor %vm372_vm4, %vm373_vm3  ;;  %v393_v33 = vand.u32 2147483648, %v366_v16  ;;  %v391_v17 = vand.u32 2147483647, %v366_v16  ;;  %vm387_vm8 = vweird.f32 %v366_v16 }
 0x244   :  { %v369_v19 = vsub.f32 1.0, %v368_v18 }
 0x245   :  { %v394_v36 = vor.u32 1.1754944e-38, %v393_v33  ;;  %vm392_vm10 = vcmp.eq.f32.partialorder %v391_v17, 8.507059e+37 }
 0x246   :  { %v370_v22 = vmul.f32 %v541_v15, %v369_v19 }
 0x248   :  { %v371_v24 = vadd.f32 %v541_v15, %v370_v22 }
 0x249   :  { %v543_v25 = vpop.eup %542 }
 0x24a   :  { %v375_v28 = vsel %vm374_vm5, %v541_v15, %v371_v24  ;;  %v383_v29 = vmul.f32 %v543_v25, %v366_v16  ;;  %vm388_vm7 = vweird.f32 %v543_v25 }
 0x24b   :  { %v380_v30 = vsel %vm377_vm6, %v379_v26, %v375_v28  ;;  %vm389_vm9 = vmor %vm387_vm8, %vm388_vm7 }
 0x24c   :  { %v397_v31 = vmul.f32 %v380_v30, %v180_v27  ;;  %v384_v32 = vsub.f32 1.0, %v383_v29 }
 0x24e   :  { %401 = vrot.lane.b32.xlu0 %v397_v31, %s704_s13  ;;  %v385_v34 = vmul.f32 %v543_v25, %v384_v32 }
 0x250   :  { %v386_v35 = vadd.f32 %v543_v25, %v385_v34 }
 0x252   :  { %v390_v38 = vsel %vm389_vm9, %v543_v25, %v386_v35 }
 0x253   :  { %v395_v39 = vsel %vm392_vm10, %v394_v36, %v390_v38 }
 0x254   :  { %v398_v40 = vmul.f32 %v395_v39, %v182_v37 }
 0x256   :  { %403 = vrot.lane.b32.xlu1 %v398_v40, %s704_s13 }
 0x2c0   :  { %v402_v41 = vpop.permute.xlu0 %401 }
 0x2c1   :  { %v407_v42 = vadd.f32 %v402_v41, %v347_v0 }
 0x2c3   :  { %544 = vtanh.f32 %v407_v42 }
 0x2c8   :  { %v404_v43 = vpop.permute.xlu1 %403 }
 0x2c9   :  { %v545_v44 = vpop.eup %544  ;;  %v408_v45 = vadd.f32 %v404_v43, %v348_v8 }
 0x2ca   :  { %413 = vrot.lane.b32.xlu2 %v545_v44, %s704_s13 }
 0x2cb   :  { %546 = vtanh.f32 %v408_v45 }
 0x2d1   :  { %v547_v46 = vpop.eup %546 }
 0x2d2   :  { %415 = vrot.lane.b32.xlu0 %v547_v46, %s704_s13 }
 0x324   :  { %v414_v47 = vpop.permute.xlu2 %413 }
 0x325   :  { %v419_v48 = vsub.f32 %v781_v6, %v414_v47 }
 0x327   :  { %423 = vrot.lane.b32.xlu1 %v419_v48, %s711_s6 }
 0x344   :  { %v416_v49 = vpop.permute.xlu0 %415 }
 0x345   :  { %v420_v50 = vsub.f32 %v783_v7, %v416_v49 }
 0x347   :  { %425 = vrot.lane.b32.xlu2 %v420_v50, %s711_s6 }
 0x399   :  { %v424_v51 = vpop.permute.xlu1 %423 }
 0x39a   :  { %v429_v52 = vmul.f32 %v424_v51, %v380_v30 }
 0x39c   :  { %433 = vrot.lane.b32.xlu0 %v429_v52, %s711_s6 }
 0x3a1   :  { %v426_v53 = vpop.permute.xlu2 %425 }
 0x3a2   :  { %v430_v54 = vmul.f32 %v426_v53, %v395_v39 }
 0x3a4   :  { %435 = vrot.lane.b32.xlu1 %v430_v54, %s711_s6 }
 0x40e   :  { %v434_v55 = vpop.permute.xlu0 %433 }
 0x40f   :  { %v439_v56 = vadd.f32 %v545_v44, %v434_v55 }
 0x411   :  { %443 = vrot.lane.b32.xlu2 %v439_v56, %s704_s13 }
 0x416   :  { %v436_v57 = vpop.permute.xlu1 %435 }
 0x417   :  { %v440_v58 = vadd.f32 %v547_v46, %v436_v57 }
 0x419   :  { %445 = vrot.lane.b32.xlu0 %v440_v58, %s704_s13 }
 0x46b   :  { %v444_v6 = vpop.permute.xlu2 %443 }
 0x46c   :  { %449 = vst.msk [vmem:[#allocation11] sm:$0xff] %vm152_vm0, %v444_v6 }
 0x48b   :  { %v446_v7 = vpop.permute.xlu0 %445 }
 0x48c   :  { %450 = vst.msk [vmem:[#allocation11 + $0x8] sm:$0xff] %vm152_vm0, %v446_v7 }
 0x48d   :  { %463 = dma.vmem_to_hbm [thread:$0]  %s456_s8, 256, %s458_s1, [#allocation4], %s701_s9, %s701_s9, %s702_s10  }
 0x48e   :  { %698 = dma.done.wait [#allocation4], 256  }
 0x48f   :  { %699 = vsyncadd [#allocation4], 4294967040 }
 0x490   :  { %468 = vsyncpa [#allocation3], 1 }
 0x491   :  { %469 = vsyncpa [#allocation6], 1 }
 0x492   :  { %470 = vsyncpa [#allocation9], 1 }
 0x493   :  { %471 = vsyncpa [#allocation4], 1 }

</bundles_post_ra>
